<compile_context>
chip_gen: v6e
topology: v6e:2x2x1
jax: 0.10.0
libtpu: 0.0.40
codegen_flags: <defaults>
</compile_context>

<pallas_src>
from functools import partial

import jax
import jax.numpy as jnp
from jax.experimental import pallas as pl
from jax.experimental.pallas import tpu as pltpu


# --------------------------------------------------------------------------
# helpers
# --------------------------------------------------------------------------
def _layernorm_channels(x, w, b, eps=1e-5):
    # x: (C, N) f32, normalized over the channel axis (axis 0).  Identical to
    # PyTorch LayerNorm over the last dim of (B, N, C) (biased var, eps in rsqrt).
    mu = jnp.mean(x, axis=0, keepdims=True)
    xc = x - mu
    var = jnp.mean(xc * xc, axis=0, keepdims=True)
    return xc * jax.lax.rsqrt(var + eps) * w + b


# --------------------------------------------------------------------------
# 1) fused transformer Block kernel (channels-major, one batch elem per step)
# --------------------------------------------------------------------------
def block_kernel(x_ref, n1w_ref, n1b_ref, wqkv_ref, wproj_ref, bproj_ref,
                 n2w_ref, n2b_ref, w1_ref, b1_ref, w2_ref, b2_ref,
                 o_ref, *, num_heads, head_dim, scale):
    C, N = x_ref.shape
    H, hd = num_heads, head_dim
    cdt = x_ref.dtype                      # MXU compute dtype (bf16-friendly)

    x = x_ref[...].astype(jnp.float32)     # (C, N) residual stream in f32

    # ---------------- attention branch ----------------
    xn = _layernorm_channels(x, n1w_ref[...], n1b_ref[...])
    # channels-major qkv: (3C, N) = Wqkv (3C, C) @ xn (C, N), f32 accumulation
    qkv = jnp.dot(wqkv_ref[...], xn.astype(wqkv_ref.dtype),
                  preferred_element_type=jnp.float32)
    qkv = qkv.reshape(3, H, hd, N)          # head split = major-dim reshape (free)
    q_t = qkv[0] * scale                    # (H, hd, N)
    k_t = qkv[1]                            # (H, hd, N)
    v_t = qkv[2]                            # (H, hd, N)

    q = jnp.swapaxes(q_t, 1, 2)             # (H, N, hd) -- minor-two swap only
    # logits: batched NN matmul on the MXU, contraction over head_dim
    s = jnp.einsum('hnd,hdm->hnm', q.astype(cdt), k_t.astype(cdt),
                   preferred_element_type=jnp.float32)          # (H, N, N)
    s = s - jnp.max(s, axis=-1, keepdims=True)
    p = jnp.exp(s)
    p = p * pl.reciprocal(jnp.sum(p, axis=-1, keepdims=True), approx=True)
    # attention output, channels-major per head: batched NT matmul -> (H, hd, N)
    o_t = jnp.einsum('hdm,hnm->hdn', v_t.astype(cdt), p.astype(cdt),
                     preferred_element_type=jnp.float32)
    o_t = o_t.reshape(C, N)                 # head merge = major-dim reshape (free)
    attn_out = jnp.dot(wproj_ref[...], o_t.astype(wproj_ref.dtype),
                       preferred_element_type=jnp.float32) + bproj_ref[...]
    # NOTE: the given Block.forward applies no LayerScale (init_values unused).
    x = x + attn_out

    # ---------------- MLP branch ----------------
    xn2 = _layernorm_channels(x, n2w_ref[...], n2b_ref[...])
    h1 = jnp.dot(w1_ref[...], xn2.astype(w1_ref.dtype),
                 preferred_element_type=jnp.float32) + b1_ref[...]
    h1 = jax.nn.gelu(h1, approximate=False)  # PyTorch nn.GELU default = exact erf
    h2 = jnp.dot(w2_ref[...], h1.astype(w2_ref.dtype),
                 preferred_element_type=jnp.float32) + b2_ref[...]
    x = x + h2

    o_ref[...] = x.astype(o_ref.dtype)


def run_block(x_t, p, *, num_heads):
    """x_t: (B, C, N) channels-major activations; p: PyTorch-layout weights."""
    B, C, N = x_t.shape
    hd = C // num_heads
    col = lambda v: v.reshape(-1, 1)        # per-channel vectors -> (D, 1)

    weights = (
        col(p["n1w"]), col(p["n1b"]),
        p["wqkv"], p["wproj"], col(p["bproj"]),
        col(p["n2w"]), col(p["n2b"]),
        p["w1"], col(p["b1"]), p["w2"], col(p["b2"]),
    )
    kernel = partial(block_kernel, num_heads=num_heads, head_dim=hd,
                     scale=hd ** (-0.5))

    def build(single_buffer_weights):
        def wspec(a):
            kw = {}
            if single_buffer_weights:
                # Grid-invariant blocks: double buffering is pure VMEM waste.
                kw["pipeline_mode"] = pl.Buffered(1)
            return pl.BlockSpec(a.shape, lambda b: (0,) * a.ndim, **kw)

        in_specs = [pl.BlockSpec((None, C, N), lambda b: (b, 0, 0))]
        in_specs += [wspec(a) for a in weights]
        return pl.pallas_call(
            kernel,
            out_shape=jax.ShapeDtypeStruct((B, C, N), x_t.dtype),
            grid=(B,),
            in_specs=in_specs,
            out_specs=pl.BlockSpec((None, C, N), lambda b: (b, 0, 0)),
            compiler_params=pltpu.CompilerParams(
                dimension_semantics=("parallel",),     # Megacore-shard batch
                vmem_limit_bytes=32 * 1024 * 1024,     # explicit scoped VMEM limit
            ),
        )

    try:
        return build(single_buffer_weights=True)(x_t, *weights)
    except Exception:
        # Fallback for Pallas versions without pipeline_mode on BlockSpec.
        return build(single_buffer_weights=False)(x_t, *weights)


# --------------------------------------------------------------------------
# 2) patch embedding projection (+bias +pos_embed), channels-major output
# --------------------------------------------------------------------------
def patch_embed_kernel(p_ref, w_ref, b_ref, pos_ref, o_ref):
    # p_ref: (P, Np) im2col patches (per batch), w_ref: (C, P)
    proj = jnp.dot(w_ref[...], p_ref[...].astype(w_ref.dtype),
                   preferred_element_type=jnp.float32)
    o_ref[...] = (proj + b_ref[...] + pos_ref[...]).astype(o_ref.dtype)


def run_patch_embed(patches_t, w_pe, b_pe, pos_t):
    B, P, Np = patches_t.shape
    C = w_pe.shape[0]
    b_col = b_pe.reshape(-1, 1)

    def wspec(a):
        return pl.BlockSpec(a.shape, lambda b: (0,) * a.ndim)

    return pl.pallas_call(
        patch_embed_kernel,
        out_shape=jax.ShapeDtypeStruct((B, C, Np), patches_t.dtype),
        grid=(B,),
        in_specs=[pl.BlockSpec((None, P, Np), lambda b: (b, 0, 0)),
                  wspec(w_pe), wspec(b_col), wspec(pos_t)],
        out_specs=pl.BlockSpec((None, C, Np), lambda b: (b, 0, 0)),
        compiler_params=pltpu.CompilerParams(
            dimension_semantics=("parallel",)),
    )(patches_t, w_pe, b_col, pos_t)


# --------------------------------------------------------------------------
# 3) final LayerNorm (on cls token only — equivalent to norm-then-slice) + head
# --------------------------------------------------------------------------
def head_kernel(cls_ref, nw_ref, nb_ref, wh_ref, bh_ref, o_ref):
    x = cls_ref[...].astype(jnp.float32)           # (B, C), tokens-major
    mu = jnp.mean(x, axis=-1, keepdims=True)
    xc = x - mu
    var = jnp.mean(xc * xc, axis=-1, keepdims=True)
    xn = xc * jax.lax.rsqrt(var + 1e-5) * nw_ref[...] + nb_ref[...]
    logits = jax.lax.dot_general(
        xn.astype(wh_ref.dtype), wh_ref[...],
        dimension_numbers=(((1,), (1,)), ((), ())),       # (B,C) x (K,C) -> (B,K)
        preferred_element_type=jnp.float32)
    o_ref[...] = (logits + bh_ref[...]).astype(o_ref.dtype)


def run_head(cls_tok, nw, nb, wh, bh):
    B, C = cls_tok.shape
    K = wh.shape[0]
    return pl.pallas_call(
        head_kernel,
        out_shape=jax.ShapeDtypeStruct((B, K), cls_tok.dtype),
    )(cls_tok, nw.reshape(1, -1), nb.reshape(1, -1), wh, bh.reshape(1, -1))


# --------------------------------------------------------------------------
# full vit_models forward (eval mode; drop_rate=0 -> head dropout is identity)
# --------------------------------------------------------------------------
def vit_forward(img, params, *, patch_size, num_heads):
    B, Cin, Hi, Wi = img.shape
    ps = patch_size
    nH, nW = Hi // ps, Wi // ps
    Np = nH * nW
    C = params["pe_w"].shape[0]

    # im2col patch extraction (layout plumbing in XLA); ordering matches
    # Conv2d(k=s=ps): inner order (c, kh, kw), patch order (ph, pw) row-major.
    p = img.reshape(B, Cin, nH, ps, nW, ps)
    p = p.transpose(0, 2, 4, 1, 3, 5).reshape(B, Np, Cin * ps * ps)
    patches_t = jnp.swapaxes(p, 1, 2)                       # (B, P, Np)

    w_pe = params["pe_w"].reshape(C, Cin * ps * ps)
    pos_t = jnp.swapaxes(params["pos_embed"], 0, 1)         # (C, Np)

    emb_t = run_patch_embed(patches_t, w_pe, params["pe_b"], pos_t)  # (B, C, Np)

    # prepend cls token (column 0) — pure layout concat in the wrapper
    cls_col = jnp.broadcast_to(params["cls_token"].reshape(1, C, 1),
                               (B, C, 1)).astype(emb_t.dtype)
    x_t = jnp.concatenate([cls_col, emb_t], axis=2)         # (B, C, N), N=Np+1

    for blk in params["blocks"]:
        x_t = run_block(x_t, blk, num_heads=num_heads)

    cls_tok = x_t[:, :, 0]                                  # (B, C)
    return run_head(cls_tok, params["norm_w"], params["norm_b"],
                    params["head_w"], params["head_b"])


# --------------------------------------------------------------------------
# pure-JAX reference (validation only)
# --------------------------------------------------------------------------
def reference(img, params, *, patch_size, num_heads):
    B, Cin, Hi, Wi = img.shape
    ps = patch_size
    nH, nW = Hi // ps, Wi // ps
    C = params["pe_w"].shape[0]

    p = img.reshape(B, Cin, nH, ps, nW, ps).transpose(0, 2, 4, 1, 3, 5)
    p = p.reshape(B, nH * nW, -1)
    x = p @ params["pe_w"].reshape(C, -1).T + params["pe_b"]
    x = x + params["pos_embed"][None]
    cls = jnp.broadcast_to(params["cls_token"].reshape(1, 1, C), (B, 1, C))
    x = jnp.concatenate([cls, x], axis=1)

    def ln(v, w, b):
        mu = jnp.mean(v, -1, keepdims=True)
        var = jnp.mean((v - mu) ** 2, -1, keepdims=True)
        return (v - mu) / jnp.sqrt(var + 1e-5) * w + b

    hd = C // num_heads
    scale = hd ** (-0.5)
    for blk in params["blocks"]:
        xn = ln(x, blk["n1w"], blk["n1b"])
        qkv = xn @ blk["wqkv"].T
        qkv = qkv.reshape(B, -1, 3, num_heads, hd).transpose(2, 0, 3, 1, 4)
        q, k, v = qkv[0] * scale, qkv[1], qkv[2]
        attn = jax.nn.softmax(q @ jnp.swapaxes(k, -2, -1), axis=-1)
        a = (attn @ v).transpose(0, 2, 1, 3).reshape(B, -1, C)
        x = x + (a @ blk["wproj"].T + blk["bproj"])
        xn2 = ln(x, blk["n2w"], blk["n2b"])
        h = jax.nn.gelu(xn2 @ blk["w1"].T + blk["b1"], approximate=False)
        x = x + (h @ blk["w2"].T + blk["b2"])
    x = ln(x, params["norm_w"], params["norm_b"])
    return x[:, 0] @ params["head_w"].T + params["head_b"]


# --------------------------------------------------------------------------
if __name__ == "__main__":
    # Small-but-representative shapes: 32x32 image, 4x4 patches -> 64 patches,
    # 65 tokens; embed_dim 128, 4 heads x head_dim 32, depth 2, 16 classes.
    B = 2
    img_size, patch_size, in_chans = 32, 4, 3
    embed_dim, num_heads, depth = 128, 4, 2
    mlp_ratio = 4.0
    num_classes = 16

    Np = (img_size // patch_size) ** 2
    hidden = int(embed_dim * mlp_ratio)

    key = jax.random.PRNGKey(0)
    keys = iter(jax.random.split(key, 8 + 4 * depth))
    nrm = lambda shape: 0.02 * jax.random.normal(next(keys), shape, jnp.float32)

    params = {
        "pe_w": nrm((embed_dim, in_chans, patch_size, patch_size)),
        "pe_b": jnp.zeros((embed_dim,), jnp.float32),
        "cls_token": nrm((embed_dim,)),
        "pos_embed": nrm((Np, embed_dim)),
        "norm_w": jnp.ones((embed_dim,), jnp.float32),
        "norm_b": jnp.zeros((embed_dim,), jnp.float32),
        "head_w": nrm((num_classes, embed_dim)),
        "head_b": jnp.zeros((num_classes,), jnp.float32),
        "blocks": [
            {
                "n1w": jnp.ones((embed_dim,), jnp.float32),
                "n1b": jnp.zeros((embed_dim,), jnp.float32),
                "wqkv": nrm((3 * embed_dim, embed_dim)),     # PyTorch (out, in)
                "wproj": nrm((embed_dim, embed_dim)),
                "bproj": jnp.zeros((embed_dim,), jnp.float32),
                "n2w": jnp.ones((embed_dim,), jnp.float32),
                "n2b": jnp.zeros((embed_dim,), jnp.float32),
                "w1": nrm((hidden, embed_dim)),
                "b1": jnp.zeros((hidden,), jnp.float32),
                "w2": nrm((embed_dim, hidden)),
                "b2": jnp.zeros((embed_dim,), jnp.float32),
            }
            for _ in range(depth)
        ],
    }

    img = jax.random.normal(next(keys), (B, in_chans, img_size, img_size),
                            jnp.float32)

    # f32 path
    out = vit_forward(img, params, patch_size=patch_size, num_heads=num_heads)
    out = jax.block_until_ready(out)
    ref = reference(img, params, patch_size=patch_size, num_heads=num_heads)
    assert out.shape == (B, num_classes)
    err = float(jnp.max(jnp.abs(out - ref)))
    assert err < 3e-3, f"f32 max err {err}"

    # Mixed-precision path: bf16 weights/activations, f32 accumulation in-kernel.
    to_bf16 = lambda t: jax.tree_util.tree_map(
        lambda a: a.astype(jnp.bfloat16), t)
    out_b = vit_forward(img.astype(jnp.bfloat16), to_bf16(params),
                        patch_size=patch_size, num_heads=num_heads)
    out_b = jax.block_until_ready(out_b).astype(jnp.float32)
    err_b = float(jnp.max(jnp.abs(out_b - ref)))
    assert err_b < 0.2, f"bf16 max err {err_b}"

    print("KERNEL_OK")
</pallas_src>

<mosaic_0001>
module attributes {stable_mosaic.version = 11 : i64} {
  func.func @patch_embed_kernel(%arg0: i32, %arg1: memref<1x48x64xf32, #tpu.memory_space<vmem>>, %arg2: memref<128x48xf32, #tpu.memory_space<vmem>>, %arg3: memref<128x1xf32, #tpu.memory_space<vmem>>, %arg4: memref<128x64xf32, #tpu.memory_space<vmem>>, %arg5: memref<1x128x64xf32, #tpu.memory_space<vmem>>) attributes {dimension_semantics = [#tpu.dimension_semantics<parallel>], iteration_bounds = array<i64: 2>, scalar_prefetch = 0 : i64, scratch_operands = 0 : i64, tpu.core_type = #tpu.core_type<tc>, window_params = [{transform_indices = @transform_0, window_bounds = array<i64: 1, 48, 64>}, {pipeline_mode = #tpu.pipeline_mode<synchronous>, transform_indices = @transform_1, window_bounds = array<i64: 128, 48>}, {pipeline_mode = #tpu.pipeline_mode<synchronous>, transform_indices = @transform_2, window_bounds = array<i64: 128, 1>}, {pipeline_mode = #tpu.pipeline_mode<synchronous>, transform_indices = @transform_3, window_bounds = array<i64: 128, 64>}, {transform_indices = @transform_4, window_bounds = array<i64: 1, 128, 64>}]} {
    %c0 = arith.constant 0 : index
    %c0_0 = arith.constant 0 : index
    %0 = vector.load %arg2[%c0, %c0_0] : memref<128x48xf32, #tpu.memory_space<vmem>>, vector<128x48xf32>
    %c0_1 = arith.constant 0 : index
    %c0_2 = arith.constant 0 : index
    %c0_3 = arith.constant 0 : index
    %1 = vector.load %arg1[%c0_1, %c0_2, %c0_3] : memref<1x48x64xf32, #tpu.memory_space<vmem>>, vector<1x48x64xf32>
    %2 = vector.shape_cast %1 : vector<1x48x64xf32> to vector<48x64xf32>
    %cst = arith.constant dense<0.000000e+00> : vector<128x64xf32>
    %3 = tpu.matmul %0, %2, %cst {dimension_numbers = #tpu.dot_dimension_numbers<[1], [0], [0], [1], [0, 0, 1, 1], [], []>} : vector<128x48xf32>, vector<48x64xf32>, vector<128x64xf32> -> vector<128x64xf32>
    %c0_4 = arith.constant 0 : index
    %c0_5 = arith.constant 0 : index
    %4 = vector.load %arg3[%c0_4, %c0_5] : memref<128x1xf32, #tpu.memory_space<vmem>>, vector<128x1xf32>
    %5 = vector.broadcast %4 : vector<128x1xf32> to vector<128x64xf32>
    %6 = arith.addf %3, %5 : vector<128x64xf32>
    %c0_6 = arith.constant 0 : index
    %c0_7 = arith.constant 0 : index
    %7 = vector.load %arg4[%c0_6, %c0_7] : memref<128x64xf32, #tpu.memory_space<vmem>>, vector<128x64xf32>
    %8 = arith.addf %6, %7 : vector<128x64xf32>
    %c0_8 = arith.constant 0 : index
    %c0_9 = arith.constant 0 : index
    %c0_10 = arith.constant 0 : index
    %9 = vector.load %arg5[%c0_8, %c0_9, %c0_10] : memref<1x128x64xf32, #tpu.memory_space<vmem>>, vector<1x128x64xf32>
    %10 = vector.shape_cast %9 : vector<1x128x64xf32> to vector<128x64xf32>
    %11 = vector.shape_cast %8 : vector<128x64xf32> to vector<1x128x64xf32>
    tpu.vector_store %arg5[%c0_8, %c0_9, %c0_10], %11 {strides = array<i32>} : memref<1x128x64xf32, #tpu.memory_space<vmem>>, vector<1x128x64xf32>,
    return
  }
  func.func @transform_0(%arg0: i32) -> (i32, i32, i32) {
    %c0_i32 = arith.constant 0 : i32
    %c0_i32_0 = arith.constant 0 : i32
    %c0_i32_1 = arith.constant 0 : i32
    return %arg0, %c0_i32, %c0_i32_0 : i32, i32, i32
  }
  func.func @transform_1(%arg0: i32) -> (i32, i32) {
    %c0_i32 = arith.constant 0 : i32
    %c0_i32_0 = arith.constant 0 : i32
    %c0_i32_1 = arith.constant 0 : i32
    return %c0_i32, %c0_i32_0 : i32, i32
  }
  func.func @transform_2(%arg0: i32) -> (i32, i32) {
    %c0_i32 = arith.constant 0 : i32
    %c0_i32_0 = arith.constant 0 : i32
    %c0_i32_1 = arith.constant 0 : i32
    return %c0_i32, %c0_i32_0 : i32, i32
  }
  func.func @transform_3(%arg0: i32) -> (i32, i32) {
    %c0_i32 = arith.constant 0 : i32
    %c0_i32_0 = arith.constant 0 : i32
    %c0_i32_1 = arith.constant 0 : i32
    return %c0_i32, %c0_i32_0 : i32, i32
  }
  func.func @transform_4(%arg0: i32) -> (i32, i32, i32) {
    %c0_i32 = arith.constant 0 : i32
    %c0_i32_0 = arith.constant 0 : i32
    %c0_i32_1 = arith.constant 0 : i32
    return %arg0, %c0_i32, %c0_i32_0 : i32, i32, i32
  }
}

</mosaic_0001>

<bundles_post_ra>
// kernel: tpu_custom_call.1
= control target key start
LH: loop header
LB: loop body
LE: loop exit
PB: predicated region body
PF: predicated region fallthrough
CT: control target
= control target key end

     0   :  { %s757_s15 = smov 0   ;;  %s981_s0 = inlined_call_operand.vmem [shape: f32[2,48,64], index: 0, kind: input, shape index: {}]   ;;  %s982_s1 = inlined_call_operand.vmem [shape: f32[128,48], index: 1, kind: input, shape index: {}]   ;;  %s983_s2 = inlined_call_operand.vmem [shape: f32[128,1], index: 2, kind: input, shape index: {}]   ;;  %s984_s3 = inlined_call_operand.vmem [shape: f32[128,64], index: 3, kind: input, shape index: {}]   ;;  %s985_s4 = inlined_call_operand.vmem [shape: f32[2,128,64], index: 4, kind: output, shape index: {}]  }
   0x1 LB: > { %s614_s16 = sadd.s32 4294967295, %s729_s15   ;;  %p618_p0 = scmp.ge.s32.totalorder %s729_s15, 1  ;;  %s729_s15 = sphi %s757_s15, %s14_s15  }
   0x2   : > { %p162_p1 = scmp.lt.s32.totalorder %s729_s15, 3 }
   0x4   : > { %p163_p2 = pnand %p618_p0, %p162_p1 }
   0x5   : > { %p188_p3 = scmp.lt.s32.totalorder (!%p163_p2), %s614_s16, 1 }
   0x6   : > { %166 = sbr.rel (%p163_p2) target bundleno = 240 (0xf0), region = 36 }
   0xb   : > { %v198_v0 = vld [vmem:[%s982_s1] sm:$0xff]  ;;  %vm316_vm0 = vcmask 392192   ;;  %s987_s16 = smov (!%p188_p3, %s614_s16), 1  ;;  %v731_v2 = vmov 0   ;;  %v222_v3 = vld [vmem:[%s983_s2 + $0x10] sm:$0xff]  ;;  %v199_v11 = vld [vmem:[%s982_s1 + $0x8] sm:$0xff] }
   0xc   : > { %v206_v1 = vld [vmem:[%s982_s1 + $0x40] sm:$0xff]  ;;  %675 = vmatprep.mubr.msk.f32.mxu0 %vm316_vm0, %v198_v0  ;;  %722 = vset.pattern.permute.xlu1 %v731_v2  ;;  %s711_s21 = smul.u32 48, %s987_s16  ;;  %v207_v12 = vld [vmem:[%s982_s1 + $0x48] sm:$0xff]  ;;  %v200_v13 = vld [vmem:[%s982_s1 + $0x10] sm:$0xff]  ;;  %s640_s11 = sshll.u32 %s987_s16, 7  ;;  %vm542_vm1 = vcmask 523264  }
   0xd   : > { %687 = vmatprep.mubr.msk.f32.mxu1 %vm316_vm0, %v206_v1  ;;  %721 = vset.pattern.permute.xlu0 %v731_v2  ;;  %v220_v4 = vld [vmem:[%s983_s2] sm:$0xff]  ;;  %v208_v14 = vld [vmem:[%s982_s1 + $0x50] sm:$0xff]  ;;  %v223_v15 = vld [vmem:[%s983_s2 + $0x18] sm:$0xff]  ;;  %s899_s20 = scalar_lea.vmem %s985_s4, %s640_s11 }
   0xe   : > { %s192_s28 = scalar_lea.vmem %s981_s0, %s711_s21  ;;  %248 = vperm.xlu1 %722, %v222_v3   ;;  %238 = vperm.xlu0 %721, %v220_v4   ;;  %v221_v16 = vld [vmem:[%s983_s2 + $0x8] sm:$0xff]  ;;  %v201_v17 = vld [vmem:[%s982_s1 + $0x18] sm:$0xff]  ;;  %v202_v19 = vld [vmem:[%s982_s1 + $0x20] sm:$0xff] }
   0xf   : > { %v219_v5 = vld [vmem:[%s192_s28 + $0x28] sm:$0xff]  ;;  %v218_v6 = vld [vmem:[%s192_s28 + $0x20] sm:$0xff]  ;;  %v217_v7 = vld [vmem:[%s192_s28 + $0x18] sm:$0xff] }
  0x10   : > { %663 = vmatprep.subr.mxu0 %v219_v5  ;;  %699 = vmatprep.subr.mxu1 %v219_v5  ;;  %v216_v8 = vld [vmem:[%s192_s28 + $0x10] sm:$0xff]  ;;  %v215_v9 = vld [vmem:[%s192_s28 + $0x8] sm:$0xff]  ;;  %v214_v10 = vld [vmem:[%s192_s28] sm:$0xff] }
  0x11   : > { %664 = vmatpush3.msra.mxu0 %v219_v5  ;;  %705 = vmatpush3.msra.mxu1 %v219_v5  ;;  %v209_v18 = vld [vmem:[%s982_s1 + $0x58] sm:$0xff]  ;;  %v210_v20 = vld [vmem:[%s982_s1 + $0x60] sm:$0xff]  ;;  %v225_v21 = vld [vmem:[%s983_s2 + $0x28] sm:$0xff] }
  0x12   : > { %665 = vmatprep.subr.mxu0 %v218_v6  ;;  %700 = vmatprep.subr.mxu1 %v218_v6  ;;  %v224_v22 = vld [vmem:[%s983_s2 + $0x20] sm:$0xff]  ;;  %v203_v23 = vld [vmem:[%s982_s1 + $0x28] sm:$0xff]  ;;  %v204_v25 = vld [vmem:[%s982_s1 + $0x30] sm:$0xff] }
  0x13   : > { %666 = vmatpush3.msra.mxu0 %v218_v6  ;;  %706 = vmatpush3.msra.mxu1 %v218_v6  ;;  %v211_v24 = vld [vmem:[%s982_s1 + $0x68] sm:$0xff]  ;;  %v212_v26 = vld [vmem:[%s982_s1 + $0x70] sm:$0xff]  ;;  %v227_v27 = vld [vmem:[%s983_s2 + $0x38] sm:$0xff] }
  0x14   : > { %667 = vmatprep.subr.mxu0 %v217_v7  ;;  %701 = vmatprep.subr.mxu1 %v217_v7  ;;  %v226_v28 = vld [vmem:[%s983_s2 + $0x30] sm:$0xff]  ;;  %v205_v29 = vld [vmem:[%s982_s1 + $0x38] sm:$0xff]  ;;  %v229_v31 = vld [vmem:[%s983_s2 + $0x48] sm:$0xff] }
  0x15   : > { %668 = vmatpush3.msra.mxu0 %v217_v7  ;;  %707 = vmatpush3.msra.mxu1 %v217_v7  ;;  %v213_v30 = vld [vmem:[%s982_s1 + $0x78] sm:$0xff]  ;;  %v228_v32 = vld [vmem:[%s983_s2 + $0x40] sm:$0xff]  ;;  %v230_v34 = vld [vmem:[%s983_s2 + $0x50] sm:$0xff] }
  0x16   : > { %669 = vmatprep.subr.mxu0 %v216_v8  ;;  %702 = vmatprep.subr.mxu1 %v216_v8  ;;  %v231_v33 = vld [vmem:[%s983_s2 + $0x58] sm:$0xff]  ;;  %v233_v35 = vld [vmem:[%s983_s2 + $0x68] sm:$0xff]  ;;  %v232_v36 = vld [vmem:[%s983_s2 + $0x60] sm:$0xff] }
  0x17   : > { %670 = vmatpush3.msra.mxu0 %v216_v8  ;;  %708 = vmatpush3.msra.mxu1 %v216_v8  ;;  %v235_v37 = vld [vmem:[%s983_s2 + $0x78] sm:$0xff]  ;;  %v234_v38 = vld [vmem:[%s983_s2 + $0x70] sm:$0xff]  ;;  %v511_v51 = vld [vmem:[%s984_s3 + $0x8] sm:$0xff] }
  0x18   : > { %671 = vmatprep.subr.mxu0 %v215_v9  ;;  %703 = vmatprep.subr.mxu1 %v215_v9  ;;  %v519_v53 = vld [vmem:[%s984_s3 + $0x48] sm:$0xff]  ;;  %v510_v58 = vld [vmem:[%s984_s3] sm:$0xff]  ;;  %v513_v2 = vld [vmem:[%s984_s3 + $0x18] sm:$0xff] }
  0x19   : > { %672 = vmatpush3.msra.mxu0 %v215_v9  ;;  %709 = vmatpush3.msra.mxu1 %v215_v9  ;;  %v518_v60 = vld [vmem:[%s984_s3 + $0x40] sm:$0xff]  ;;  %v521_v4 = vld [vmem:[%s984_s3 + $0x58] sm:$0xff] }
  0x1a   : > { %673 = vmatprep.subr.mxu0 %v214_v10  ;;  %704 = vmatprep.subr.mxu1 %v214_v10 }
  0x1b   : > { %674 = vmatpush3.msra.mxu0 %v214_v10  ;;  %710 = vmatpush3.msra.mxu1 %v214_v10 }
  0x1c   : > { %676 = vmatmul.mubr.msk.f32.vlgmr.msra.gmra.mxu0 %vm316_vm0, %v199_v11  ;;  %688 = vmatmul.mubr.msk.f32.vlgmr.msra.gmra.mxu1 %vm316_vm0, %v207_v12  ;;  %v512_v11 = vld [vmem:[%s984_s3 + $0x10] sm:$0xff] }
  0x1d   : > { %678 = vmatprep.mubr.msk.f32.mxu0 %vm316_vm0, %v200_v13  ;;  %690 = vmatprep.mubr.msk.f32.mxu1 %vm316_vm0, %v208_v14  ;;  %v520_v13 = vld [vmem:[%s984_s3 + $0x50] sm:$0xff] }
  0x1e   : > { %253 = vperm.xlu1 %722, %v223_v15   ;;  %243 = vperm.xlu0 %721, %v221_v16  }
  0x20   : > { %679 = vmatmul.mubr.msk.f32.gmra.mxu0 %vm316_vm0, %v201_v17  ;;  %691 = vmatmul.mubr.msk.f32.gmra.mxu1 %vm316_vm0, %v209_v18 }
  0x21   : > { %681 = vmatprep.mubr.msk.f32.mxu0 %vm316_vm0, %v202_v19  ;;  %693 = vmatprep.mubr.msk.f32.mxu1 %vm316_vm0, %v210_v20  ;;  %v515_v20 = vld [vmem:[%s984_s3 + $0x28] sm:$0xff] }
  0x22   : > { %263 = vperm.xlu1 %722, %v225_v21   ;;  %258 = vperm.xlu0 %721, %v224_v22   ;;  %v523_v22 = vld [vmem:[%s984_s3 + $0x68] sm:$0xff] }
  0x24   : > { %682 = vmatmul.mubr.msk.f32.gmra.mxu0 %vm316_vm0, %v203_v23  ;;  %694 = vmatmul.mubr.msk.f32.gmra.mxu1 %vm316_vm0, %v211_v24 }
  0x25   : > { %684 = vmatprep.mubr.msk.f32.mxu0 %vm316_vm0, %v204_v25  ;;  %696 = vmatprep.mubr.msk.f32.mxu1 %vm316_vm0, %v212_v26 }
  0x26   : > { %273 = vperm.xlu1 %722, %v227_v27   ;;  %268 = vperm.xlu0 %721, %v226_v28   ;;  %v514_v28 = vld [vmem:[%s984_s3 + $0x20] sm:$0xff] }
  0x28   : > { %685 = vmatmul.mubr.msk.f32.gmra.mxu0 %vm316_vm0, %v205_v29  ;;  %697 = vmatmul.mubr.msk.f32.gmra.mxu1 %vm316_vm0, %v213_v30  ;;  %v522_v30 = vld [vmem:[%s984_s3 + $0x60] sm:$0xff] }
  0x2a   : > { %283 = vperm.xlu1 %722, %v229_v31   ;;  %278 = vperm.xlu0 %721, %v228_v32  }
  0x2e   : > { %293 = vperm.xlu1 %722, %v231_v33   ;;  %288 = vperm.xlu0 %721, %v230_v34  }
  0x32   : > { %303 = vperm.xlu1 %722, %v233_v35   ;;  %298 = vperm.xlu0 %721, %v232_v36  }
  0x36   : > { %313 = vperm.xlu1 %722, %v235_v37   ;;  %308 = vperm.xlu0 %721, %v234_v38   ;;  %v517_v37 = vld [vmem:[%s984_s3 + $0x38] sm:$0xff] }
  0x89   : > { %v249_v39 = vpop.permute.xlu1 %248  ;;  %v239_v40 = vpop.permute.xlu0 %238 }
  0x99   : > { %v254_v41 = vpop.permute.xlu1 %253  ;;  %v244_v42 = vpop.permute.xlu0 %243 }
  0x9d   : > { %v264_v43 = vpop.permute.xlu1 %263  ;;  %v883_v44 = vpop.permute.xlu0 %258 }
  0xa1   : > { %v885_v45 = vpop.permute.xlu1 %273  ;;  %v887_v46 = vpop.permute.xlu0 %268 }
  0xa5   : > { %v284_v47 = vpop.permute.xlu1 %283  ;;  %v279_v48 = vpop.permute.xlu0 %278 }
  0xa9   : > { %v294_v49 = vpop.permute.xlu1 %293  ;;  %v289_v54 = vpop.permute.xlu0 %288 }
  0xad   : > { %v304_v5 = vpop.permute.xlu1 %303  ;;  %v299_v14 = vpop.permute.xlu0 %298 }
  0xb1   : > { %v314_v31 = vpop.permute.xlu1 %313 }
  0xdc   : > { %v677_v50 = vpop.f32.mrf.mxu0  ;;  %v689_v52 = vpop.f32.mrf.mxu1 }
  0xdd   : > { %v437_v55 = vadd.f32 %v677_v50, %v244_v42  ;;  %v477_v56 = vadd.f32 %v689_v52, %v284_v47  ;;  %v524_v50 = vld [vmem:[%s984_s3 + $0x70] sm:$0xff] }
  0xde   : > { %v431_v57 = vpop.f32.mrf.mxu0  ;;  %v471_v59 = vpop.f32.mrf.mxu1 }
  0xdf   : > { %v527_v61 = vadd.f32 %v511_v51, %v437_v55  ;;  %v535_v62 = vadd.f32 %v519_v53, %v477_v56  ;;  %v432_v63 = vadd.f32 %v431_v57, %v239_v40  ;;  %v472_v0 = vadd.f32 %v471_v59, %v279_v48  ;;  %v309_v40 = vpop.permute.xlu0 %308  ;;  %v516_v48 = vld [vmem:[%s984_s3 + $0x30] sm:$0xff] }
  0xe0   : > { %v680_v1 = vpop.f32.mrf.mxu0  ;;  %v692_v3 = vpop.f32.mrf.mxu1 }
  0xe1   : > { %544 = vst.msk [vmem:[%s899_s20 + $0x8] sm:$0xff] %vm542_vm1, %v527_v61  ;;  %552 = vst.msk [vmem:[%s899_s20 + $0x48] sm:$0xff] %vm542_vm1, %v535_v62  ;;  %v526_v6 = vadd.f32 %v510_v58, %v432_v63  ;;  %v534_v7 = vadd.f32 %v518_v60, %v472_v0  ;;  %v447_v8 = vadd.f32 %v680_v1, %v254_v41 }
  0xe2   : > { %v487_v9 = vadd.f32 %v692_v3, %v294_v49  ;;  %v441_v10 = vpop.f32.mrf.mxu0  ;;  %v481_v12 = vpop.f32.mrf.mxu1 }
  0xe3   : > { %543 = vst.msk [vmem:[%s899_s20] sm:$0xff] %vm542_vm1, %v526_v6  ;;  %551 = vst.msk [vmem:[%s899_s20 + $0x40] sm:$0xff] %vm542_vm1, %v534_v7  ;;  %v529_v15 = vadd.f32 %v513_v2, %v447_v8  ;;  %v442_v17 = vadd.f32 %v441_v10, %v249_v39  ;;  %v482_v18 = vadd.f32 %v481_v12, %v289_v54  ;;  %v525_v39 = vld [vmem:[%s984_s3 + $0x78] sm:$0xff] }
  0xe4   : > { %v537_v16 = vadd.f32 %v521_v4, %v487_v9  ;;  %v683_v19 = vpop.f32.mrf.mxu0  ;;  %v695_v21 = vpop.f32.mrf.mxu1 }
  0xe5   : > { %546 = vst.msk [vmem:[%s899_s20 + $0x18] sm:$0xff] %vm542_vm1, %v529_v15  ;;  %v528_v23 = vadd.f32 %v512_v11, %v442_v17  ;;  %v536_v24 = vadd.f32 %v520_v13, %v482_v18  ;;  %v457_v25 = vadd.f32 %v683_v19, %v264_v43  ;;  %v497_v26 = vadd.f32 %v695_v21, %v304_v5 }
  0xe6   : > { %554 = vst.msk [vmem:[%s899_s20 + $0x58] sm:$0xff] %vm542_vm1, %v537_v16  ;;  %v451_v27 = vpop.f32.mrf.mxu0  ;;  %v491_v29 = vpop.f32.mrf.mxu1 }
  0xe7   : > { %545 = vst.msk [vmem:[%s899_s20 + $0x10] sm:$0xff] %vm542_vm1, %v528_v23  ;;  %553 = vst.msk [vmem:[%s899_s20 + $0x50] sm:$0xff] %vm542_vm1, %v536_v24  ;;  %v531_v32 = vadd.f32 %v515_v20, %v457_v25  ;;  %v539_v33 = vadd.f32 %v523_v22, %v497_v26  ;;  %v452_v34 = vadd.f32 %v451_v27, %v883_v44 }
  0xe8   : > { %v492_v35 = vadd.f32 %v491_v29, %v299_v14  ;;  %v686_v36 = vpop.f32.mrf.mxu0  ;;  %v698_v38 = vpop.f32.mrf.mxu1 }
  0xe9   : > { %548 = vst.msk [vmem:[%s899_s20 + $0x28] sm:$0xff] %vm542_vm1, %v531_v32  ;;  %556 = vst.msk [vmem:[%s899_s20 + $0x68] sm:$0xff] %vm542_vm1, %v539_v33  ;;  %v530_v41 = vadd.f32 %v514_v28, %v452_v34  ;;  %v467_v43 = vadd.f32 %v686_v36, %v885_v45  ;;  %v507_v44 = vadd.f32 %v698_v38, %v314_v31 }
  0xea   : > { %v538_v42 = vadd.f32 %v522_v30, %v492_v35  ;;  %v461_v47 = vpop.f32.mrf.mxu0  ;;  %v501_v49 = vpop.f32.mrf.mxu1 }
  0xeb   : > { %547 = vst.msk [vmem:[%s899_s20 + $0x20] sm:$0xff] %vm542_vm1, %v530_v41  ;;  %v533_v51 = vadd.f32 %v517_v37, %v467_v43  ;;  %v541_v52 = vadd.f32 %v525_v39, %v507_v44  ;;  %v462_v45 = vadd.f32 %v461_v47, %v887_v46  ;;  %v502_v53 = vadd.f32 %v501_v49, %v309_v40 }
  0xec   : > { %555 = vst.msk [vmem:[%s899_s20 + $0x60] sm:$0xff] %vm542_vm1, %v538_v42 }
  0xed   : > { %550 = vst.msk [vmem:[%s899_s20 + $0x38] sm:$0xff] %vm542_vm1, %v533_v51  ;;  %558 = vst.msk [vmem:[%s899_s20 + $0x78] sm:$0xff] %vm542_vm1, %v541_v52  ;;  %v532_v54 = vadd.f32 %v516_v48, %v462_v45  ;;  %v540_v55 = vadd.f32 %v524_v50, %v502_v53 }
  0xef   : > { %549 = vst.msk [vmem:[%s899_s20 + $0x30] sm:$0xff] %vm542_vm1, %v532_v54  ;;  %557 = vst.msk [vmem:[%s899_s20 + $0x70] sm:$0xff] %vm542_vm1, %v540_v55 }
  0xf0 PF: > { %s14_s15 = sadd.s32 1, %s729_s15  }
  0xf1   : > { %p11_p4 = scmp.ge.s32.totalorder %s14_s15, 4  }
  0xf3   :  { %13 = sbr.rel (!%p11_p4) target bundleno = 1 (0x1), region = 66 }

</bundles_post_ra>
